<compile_context>
chip_gen: v7x
topology: tpu7x:2x2x1
jax: 0.10.0
libtpu: 0.0.40
codegen_flags: <defaults>
</compile_context>

<pallas_src>
import functools
from typing import NamedTuple

import jax
import jax.numpy as jnp
from jax.experimental import pallas as pl
from jax.experimental.pallas import tpu as pltpu


def _round_up(x: int, m: int) -> int:
    return ((x + m - 1) // m) * m


# --------------------------------------------------------------------------
# Kernel
# --------------------------------------------------------------------------
def _actor_kernel(x_ref, w1_ref, b1_ref, w2_ref, b2_ref, w3_ref, b3_ref,
                  o_ref, *, max_action: float):
    # MXU operands follow the weight dtype (bf16 fast path or f32); the
    # accumulation and the bias/ReLU/tanh epilogue are always f32 (no bf16
    # VPU/EUP on v5e).
    cdt = w1_ref.dtype

    # Layer 1: Linear(state_dim, 256) + ReLU
    h1 = jnp.dot(x_ref[...], w1_ref[...], preferred_element_type=jnp.float32)
    h1 = jnp.maximum(h1 + b1_ref[...], 0.0)

    # Layer 2: Linear(256, 256) + ReLU
    h2 = jnp.dot(h1.astype(cdt), w2_ref[...],
                 preferred_element_type=jnp.float32)
    h2 = jnp.maximum(h2 + b2_ref[...], 0.0)

    # Head: Linear(256, ad_pad) + Tanh, scaled by max_action
    a = jnp.dot(h2.astype(cdt), w3_ref[...],
                preferred_element_type=jnp.float32)
    a = jnp.tanh(a + b3_ref[...])
    o_ref[...] = (max_action * a).astype(o_ref.dtype)


# --------------------------------------------------------------------------
# One-time parameter preparation (hoisted out of the per-call path)
# --------------------------------------------------------------------------
class ActorParams(NamedTuple):
    w1: jax.Array          # (state_dim, 256)   compute_dtype
    b1: jax.Array          # (1, 256)           f32
    w2: jax.Array          # (256, 256)         compute_dtype
    b2: jax.Array          # (1, 256)           f32
    w3: jax.Array          # (256, ad_pad)      compute_dtype, zero-padded lanes
    b3: jax.Array          # (1, ad_pad)        f32, zero-padded lanes
    action_dim: int        # true (unpadded) action dimension


def prepare_actor_params(raw_params, compute_dtype=jnp.bfloat16) -> ActorParams:
    """Pad the head to lane-dense width and cast weights once, at init time."""
    w1, b1, w2, b2, w3, b3 = raw_params
    hidden = w1.shape[1]
    action_dim = w3.shape[1]
    ad_pad = max(128, _round_up(action_dim, 128))
    if ad_pad != action_dim:
        w3 = jnp.zeros((hidden, ad_pad), w3.dtype).at[:, :action_dim].set(w3)
        b3 = jnp.zeros((1, ad_pad), b3.dtype).at[:, :action_dim].set(
            b3.reshape(1, action_dim))
    return ActorParams(
        w1=w1.astype(compute_dtype),
        b1=b1.astype(jnp.float32).reshape(1, hidden),
        w2=w2.astype(compute_dtype),
        b2=b2.astype(jnp.float32).reshape(1, hidden),
        w3=w3.astype(compute_dtype),
        b3=b3.astype(jnp.float32).reshape(1, ad_pad),
        action_dim=action_dim,
    )


# --------------------------------------------------------------------------
# Forward pass
# --------------------------------------------------------------------------
def actor_forward(state, params: ActorParams, max_action: float, *,
                  block_batch: int = 2048, out_dtype=jnp.float32):
    """Fused Actor forward on TPU.

    block_batch: max rows per grid step (8-aligned).  2048 keeps per-step
    VMEM at ~8 MiB (inputs + lane-dense output double buffers + two (tb,256)
    f32 intermediates + resident params) — comfortably inside even v7x's
    64 MiB — while amortizing the ~0.35 us per-step overhead.
    """
    w1, b1, w2, b2, w3, b3, action_dim = params
    batch, state_dim = state.shape
    hidden = w1.shape[1]
    ad_pad = w3.shape[1]
    cdt = w1.dtype

    # Stream the input already in the MXU compute dtype.
    x = state.astype(cdt)

    # ---- Batch tile: 8-aligned, capped by block_batch, and small enough to
    # give >= 2 grid steps when the batch allows (feeds both v7x TCs). -------
    tb = min(int(block_batch), max(8, _round_up(pl.cdiv(batch, 2), 8)))
    tb = max(8, 8 * (tb // 8))
    grid = (pl.cdiv(batch, tb),)

    # ---- VMEM budget; raise the scoped limit only if we actually exceed the
    # 32 MiB default (v6e/v7x).  ---------------------------------------------
    cbytes = jnp.dtype(cdt).itemsize
    obytes = jnp.dtype(out_dtype).itemsize
    param_bytes = sum(int(p.size) * p.dtype.itemsize
                      for p in (w1, b1, w2, b2, w3, b3))
    vmem_budget = (2 * tb * state_dim * cbytes        # input double buffer
                   + 2 * tb * ad_pad * obytes         # output double buffer
                   + 2 * param_bytes                  # params (conservative)
                   + 2 * tb * hidden * 4              # h1/h2 f32 intermediates
                   + (2 << 20))                       # headroom
    vmem_limit = int(vmem_budget) if vmem_budget > (32 << 20) else None

    kernel = functools.partial(_actor_kernel, max_action=float(max_action))

    # ---- Advisory cost estimate for the XLA scheduler. ---------------------
    flops = 2 * batch * (state_dim * hidden + hidden * hidden + hidden * ad_pad)
    bytes_accessed = (batch * state_dim * cbytes      # streamed input
                      + batch * ad_pad * obytes       # streamed output
                      + param_bytes)                  # resident params (once)
    cost = pl.CostEstimate(flops=int(flops),
                           transcendentals=int(batch * ad_pad),
                           bytes_accessed=int(bytes_accessed))

    out_padded = pl.pallas_call(
        kernel,
        out_shape=jax.ShapeDtypeStruct((batch, ad_pad), out_dtype),
        grid=grid,
        in_specs=[
            # Activations: streamed per batch tile (partial last block OK:
            # OOB reads only touch rows whose writes are dropped).
            pl.BlockSpec((tb, state_dim), lambda i: (i, 0)),
            # Parameters: constant index_map -> VMEM-resident across steps.
            pl.BlockSpec((state_dim, hidden), lambda i: (0, 0)),
            pl.BlockSpec((1, hidden), lambda i: (0, 0)),
            pl.BlockSpec((hidden, hidden), lambda i: (0, 0)),
            pl.BlockSpec((1, hidden), lambda i: (0, 0)),
            pl.BlockSpec((hidden, ad_pad), lambda i: (0, 0)),
            pl.BlockSpec((1, ad_pad), lambda i: (0, 0)),
        ],
        out_specs=pl.BlockSpec((tb, ad_pad), lambda i: (i, 0)),
        compiler_params=pltpu.CompilerParams(
            dimension_semantics=("parallel",),
            vmem_limit_bytes=vmem_limit),
        cost_estimate=cost,
    )(x, w1, b1, w2, b2, w3, b3)

    # Strip the lane padding (batch is already exact).
    return out_padded[:, :action_dim]


# --------------------------------------------------------------------------
# Parameter init mirroring the PyTorch module
# --------------------------------------------------------------------------
def init_actor_params(key, state_dim: int, action_dim: int,
                      init_w: float = 0.003):
    """Shapes/init mirroring the PyTorch Actor.

    Hidden layers: nn.Linear default U(-1/sqrt(fan_in), +1/sqrt(fan_in)).
    Head: weights_init -> U(-init_w, +init_w).
    Weights are stored (in, out) so the kernel computes x @ W + b
    (== x @ W.T + b with PyTorch's (out, in) layout).
    """
    k1, k2, k3, k4, k5, k6 = jax.random.split(key, 6)
    bound1 = 1.0 / jnp.sqrt(jnp.float32(state_dim))
    bound2 = 1.0 / jnp.sqrt(jnp.float32(256))
    w1 = jax.random.uniform(k1, (state_dim, 256), jnp.float32, -bound1, bound1)
    b1 = jax.random.uniform(k2, (1, 256), jnp.float32, -bound1, bound1)
    w2 = jax.random.uniform(k3, (256, 256), jnp.float32, -bound2, bound2)
    b2 = jax.random.uniform(k4, (1, 256), jnp.float32, -bound2, bound2)
    w3 = jax.random.uniform(k5, (256, action_dim), jnp.float32, -init_w, init_w)
    b3 = jax.random.uniform(k6, (1, action_dim), jnp.float32, -init_w, init_w)
    return (w1, b1, w2, b2, w3, b3)


def _reference_forward(state, raw_params, max_action: float):
    w1, b1, w2, b2, w3, b3 = raw_params
    h1 = jnp.maximum(state @ w1 + b1, 0.0)
    h2 = jnp.maximum(h1 @ w2 + b2, 0.0)
    return max_action * jnp.tanh(h2 @ w3 + b3)


if __name__ == "__main__":
    state_dim = 16
    action_dim = 4
    max_action = 2.5

    key = jax.random.PRNGKey(0)
    k_params, k_state, k_big = jax.random.split(key, 3)
    raw = init_actor_params(k_params, state_dim, action_dim, init_w=0.003)
    ref_small_state = jax.random.normal(k_state, (2, state_dim), jnp.float32)
    big_state = jax.random.normal(k_big, (40, state_dim), jnp.float32)

    # One-time parameter prep (pad + cast), done outside the call path.
    params_bf16 = prepare_actor_params(raw, compute_dtype=jnp.bfloat16)
    params_f32 = prepare_actor_params(raw, compute_dtype=jnp.float32)

    # --- Exact-path check (f32 MXU operands), tiny act()-style batch. -------
    out_f32 = actor_forward(ref_small_state, params_f32, max_action)
    out_f32 = jax.block_until_ready(out_f32)
    ref_small = _reference_forward(ref_small_state, raw, max_action)
    assert out_f32.shape == (2, action_dim)
    assert jnp.allclose(out_f32, ref_small, atol=1e-5, rtol=1e-5)

    # --- Default bf16 fast path, tiny batch (single partial block). ---------
    out_bf16 = actor_forward(ref_small_state, params_bf16, max_action)
    out_bf16 = jax.block_until_ready(out_bf16)
    assert out_bf16.shape == (2, action_dim)
    assert jnp.allclose(out_bf16, ref_small, atol=5e-2, rtol=5e-2)

    # --- Multi-step grid with a partial last block (batch=40, tb=16). -------
    big_ref = _reference_forward(big_state, raw, max_action)
    big_f32 = actor_forward(big_state, params_f32, max_action, block_batch=16)
    big_f32 = jax.block_until_ready(big_f32)
    assert big_f32.shape == (40, action_dim)
    assert jnp.allclose(big_f32, big_ref, atol=1e-5, rtol=1e-5)

    big_bf16 = actor_forward(big_state, params_bf16, max_action,
                             block_batch=16)
    big_bf16 = jax.block_until_ready(big_bf16)
    assert big_bf16.shape == (40, action_dim)
    assert jnp.allclose(big_bf16, big_ref, atol=5e-2, rtol=5e-2)

    print("KERNEL_OK")
</pallas_src>

<mosaic_0001>
module attributes {stable_mosaic.version = 11 : i64} {
  func.func @_actor_kernel(%arg0: i32, %arg1: memref<8x16xf32, #tpu.memory_space<vmem>>, %arg2: memref<16x256xf32, #tpu.memory_space<vmem>>, %arg3: memref<1x256xf32, #tpu.memory_space<vmem>>, %arg4: memref<256x256xf32, #tpu.memory_space<vmem>>, %arg5: memref<1x256xf32, #tpu.memory_space<vmem>>, %arg6: memref<256x128xf32, #tpu.memory_space<vmem>>, %arg7: memref<1x128xf32, #tpu.memory_space<vmem>>, %arg8: memref<8x128xf32, #tpu.memory_space<vmem>>) attributes {dimension_semantics = [#tpu.dimension_semantics<parallel>], iteration_bounds = array<i64: 1>, scalar_prefetch = 0 : i64, scratch_operands = 0 : i64, tpu.core_type = #tpu.core_type<tc>, window_params = [{transform_indices = @transform_0, window_bounds = array<i64: 8, 16>}, {pipeline_mode = #tpu.pipeline_mode<synchronous>, transform_indices = @transform_1, window_bounds = array<i64: 16, 256>}, {pipeline_mode = #tpu.pipeline_mode<synchronous>, transform_indices = @transform_2, window_bounds = array<i64: 1, 256>}, {pipeline_mode = #tpu.pipeline_mode<synchronous>, transform_indices = @transform_3, window_bounds = array<i64: 256, 256>}, {pipeline_mode = #tpu.pipeline_mode<synchronous>, transform_indices = @transform_4, window_bounds = array<i64: 1, 256>}, {pipeline_mode = #tpu.pipeline_mode<synchronous>, transform_indices = @transform_5, window_bounds = array<i64: 256, 128>}, {pipeline_mode = #tpu.pipeline_mode<synchronous>, transform_indices = @transform_6, window_bounds = array<i64: 1, 128>}, {transform_indices = @transform_7, window_bounds = array<i64: 8, 128>}]} {
    %c0 = arith.constant 0 : index
    %c0_0 = arith.constant 0 : index
    %0 = vector.load %arg1[%c0, %c0_0] : memref<8x16xf32, #tpu.memory_space<vmem>>, vector<8x16xf32>
    %c0_1 = arith.constant 0 : index
    %c0_2 = arith.constant 0 : index
    %1 = vector.load %arg2[%c0_1, %c0_2] : memref<16x256xf32, #tpu.memory_space<vmem>>, vector<16x256xf32>
    %cst = arith.constant dense<0.000000e+00> : vector<8x256xf32>
    %2 = tpu.matmul %0, %1, %cst {dimension_numbers = #tpu.dot_dimension_numbers<[1], [0], [0], [1], [0, 0, 1, 1], [], []>} : vector<8x16xf32>, vector<16x256xf32>, vector<8x256xf32> -> vector<8x256xf32>
    %c0_3 = arith.constant 0 : index
    %c0_4 = arith.constant 0 : index
    %3 = vector.load %arg3[%c0_3, %c0_4] : memref<1x256xf32, #tpu.memory_space<vmem>>, vector<1x256xf32>
    %4 = vector.broadcast %3 : vector<1x256xf32> to vector<8x256xf32>
    %5 = arith.addf %2, %4 : vector<8x256xf32>
    %cst_5 = arith.constant 0.000000e+00 : f32
    %6 = vector.broadcast %cst_5 : f32 to vector<8x256xf32>
    %7 = arith.maximumf %5, %6 : vector<8x256xf32>
    %c0_6 = arith.constant 0 : index
    %c0_7 = arith.constant 0 : index
    %8 = vector.load %arg4[%c0_6, %c0_7] : memref<256x256xf32, #tpu.memory_space<vmem>>, vector<256x256xf32>
    %cst_8 = arith.constant dense<0.000000e+00> : vector<8x256xf32>
    %9 = tpu.matmul %7, %8, %cst_8 {dimension_numbers = #tpu.dot_dimension_numbers<[1], [0], [0], [1], [0, 0, 1, 1], [], []>} : vector<8x256xf32>, vector<256x256xf32>, vector<8x256xf32> -> vector<8x256xf32>
    %c0_9 = arith.constant 0 : index
    %c0_10 = arith.constant 0 : index
    %10 = vector.load %arg5[%c0_9, %c0_10] : memref<1x256xf32, #tpu.memory_space<vmem>>, vector<1x256xf32>
    %11 = vector.broadcast %10 : vector<1x256xf32> to vector<8x256xf32>
    %12 = arith.addf %9, %11 : vector<8x256xf32>
    %cst_11 = arith.constant 0.000000e+00 : f32
    %13 = vector.broadcast %cst_11 : f32 to vector<8x256xf32>
    %14 = arith.maximumf %12, %13 : vector<8x256xf32>
    %c0_12 = arith.constant 0 : index
    %c0_13 = arith.constant 0 : index
    %15 = vector.load %arg6[%c0_12, %c0_13] : memref<256x128xf32, #tpu.memory_space<vmem>>, vector<256x128xf32>
    %cst_14 = arith.constant dense<0.000000e+00> : vector<8x128xf32>
    %16 = tpu.matmul %14, %15, %cst_14 {dimension_numbers = #tpu.dot_dimension_numbers<[1], [0], [0], [1], [0, 0, 1, 1], [], []>} : vector<8x256xf32>, vector<256x128xf32>, vector<8x128xf32> -> vector<8x128xf32>
    %c0_15 = arith.constant 0 : index
    %c0_16 = arith.constant 0 : index
    %17 = vector.load %arg7[%c0_15, %c0_16] : memref<1x128xf32, #tpu.memory_space<vmem>>, vector<1x128xf32>
    %18 = vector.broadcast %17 : vector<1x128xf32> to vector<8x128xf32>
    %19 = arith.addf %16, %18 : vector<8x128xf32>
    %20 = math.tanh %19 : vector<8x128xf32>
    %cst_17 = arith.constant 2.500000e+00 : f32
    %21 = vector.broadcast %cst_17 : f32 to vector<8x128xf32>
    %22 = arith.mulf %21, %20 : vector<8x128xf32>
    %c0_18 = arith.constant 0 : index
    %c0_19 = arith.constant 0 : index
    %23 = vector.load %arg8[%c0_18, %c0_19] : memref<8x128xf32, #tpu.memory_space<vmem>>, vector<8x128xf32>
    tpu.vector_store %arg8[%c0_18, %c0_19], %22 {strides = array<i32>} : memref<8x128xf32, #tpu.memory_space<vmem>>, vector<8x128xf32>,
    return
  }
  func.func @transform_0(%arg0: i32) -> (i32, i32) {
    %c0_i32 = arith.constant 0 : i32
    %c0_i32_0 = arith.constant 0 : i32
    return %arg0, %c0_i32 : i32, i32
  }
  func.func @transform_1(%arg0: i32) -> (i32, i32) {
    %c0_i32 = arith.constant 0 : i32
    %c0_i32_0 = arith.constant 0 : i32
    %c0_i32_1 = arith.constant 0 : i32
    return %c0_i32, %c0_i32_0 : i32, i32
  }
  func.func @transform_2(%arg0: i32) -> (i32, i32) {
    %c0_i32 = arith.constant 0 : i32
    %c0_i32_0 = arith.constant 0 : i32
    %c0_i32_1 = arith.constant 0 : i32
    return %c0_i32, %c0_i32_0 : i32, i32
  }
  func.func @transform_3(%arg0: i32) -> (i32, i32) {
    %c0_i32 = arith.constant 0 : i32
    %c0_i32_0 = arith.constant 0 : i32
    %c0_i32_1 = arith.constant 0 : i32
    return %c0_i32, %c0_i32_0 : i32, i32
  }
  func.func @transform_4(%arg0: i32) -> (i32, i32) {
    %c0_i32 = arith.constant 0 : i32
    %c0_i32_0 = arith.constant 0 : i32
    %c0_i32_1 = arith.constant 0 : i32
    return %c0_i32, %c0_i32_0 : i32, i32
  }
  func.func @transform_5(%arg0: i32) -> (i32, i32) {
    %c0_i32 = arith.constant 0 : i32
    %c0_i32_0 = arith.constant 0 : i32
    %c0_i32_1 = arith.constant 0 : i32
    return %c0_i32, %c0_i32_0 : i32, i32
  }
  func.func @transform_6(%arg0: i32) -> (i32, i32) {
    %c0_i32 = arith.constant 0 : i32
    %c0_i32_0 = arith.constant 0 : i32
    %c0_i32_1 = arith.constant 0 : i32
    return %c0_i32, %c0_i32_0 : i32, i32
  }
  func.func @transform_7(%arg0: i32) -> (i32, i32) {
    %c0_i32 = arith.constant 0 : i32
    %c0_i32_0 = arith.constant 0 : i32
    return %arg0, %c0_i32 : i32, i32
  }
}

</mosaic_0001>

<bundles_post_ra>
// kernel: tpu_custom_call.1
= control target key start
LH: loop header
LB: loop body
LE: loop exit
PB: predicated region body
PF: predicated region fallthrough
CT: control target
= control target key end

     0   :  { %12 = vsyncpa [#allocation3], 0  ;;  %s865_s0 = inlined_call_operand.hbm [shape: f32[2,16], index: 0, kind: input, shape index: {}]   ;;  %s866_s1 = inlined_call_operand.hbm [shape: f32[16,256], index: 1, kind: input, shape index: {}]   ;;  %s867_s2 = inlined_call_operand.vmem [shape: f32[1,256], index: 2, kind: input, shape index: {}]   ;;  %s868_s3 = inlined_call_operand.hbm [shape: f32[256,256], index: 3, kind: input, shape index: {}]   ;;  %s869_s4 = inlined_call_operand.vmem [shape: f32[1,256], index: 4, kind: input, shape index: {}]   ;;  %s870_s5 = inlined_call_operand.hbm [shape: f32[256,128], index: 5, kind: input, shape index: {}]   ;;  %s871_s6 = inlined_call_operand.vmem [shape: f32[1,128], index: 6, kind: input, shape index: {}]   ;;  %s872_s7 = inlined_call_operand.hbm [shape: f32[2,128], index: 7, kind: output, shape index: {}]  }
   0x1   :  { %13 = vsyncpa [#allocation6], 0 }
   0x2   :  { %14 = vsyncpa [#allocation9], 0 }
   0x3   :  { %15 = vsyncpa [#allocation4], 0 }
   0x4   :  { %20 = vsyncadd [#allocation3], 96  ;;  %s725_s24 = smov [#allocation5]   ;;  %s607_s28 = scalar_lea.hbm %s866_s1, 512 }
   0x5   :  { %s33_s25 = sshll.u32 %s725_s24, 4  ;;  %p608_p0 = scmp.ne.s32.totalorder %s866_s1, %s607_s28  ;;  %s34_s25 = int_to_ptr.vmem [resolvable:$true] %s33_s25 }
   0x6   :  { %p611_p1 = scmp.lt.u32.totalorder %s607_s28, %s866_s1 }
   0x8   :  { %p613_p2 = pnand %p611_p1, %p608_p0 }
   0xa   :  { %616 = shalt.err (!%p613_p2)
}
   0xb   :  { %s617_s10 = scalar_lea.vmem %s34_s25, 512  ;;  %p622_p4 = scmp.lt.s32.totalorder %s34_s25, %s34_s25 }
   0xc   :  { %p618_p3 = scmp.ne.s32.totalorder %s34_s25, %s617_s10  ;;  %p623_p5 = scmp.lt.s32.totalorder %s617_s10, %s617_s10 }
   0xe   :  { %p624_p6 = por %p623_p5, %p622_p4 }
  0x10   :  { %p625_p7 = pnand %p624_p6, %p618_p3 }
  0x12   :  { %628 = shalt.err (!%p625_p7)
}
  0x13   :  { %s726_s11 = smov 256   ;;  %s727_s12 = smov 16  }
  0x14   :  { %39 = dma.hbm_to_vmem [thread:$0]  %s866_s1, 512, %s34_s25, [#allocation6], %s726_s11, %s726_s11, %s727_s12  }
  0x15   :  { %s728_s15 = smov [#allocation2]   ;;  %s629_s19 = scalar_lea.hbm %s865_s0, 32 }
  0x16   :  { %s21_s16 = sshll.u32 %s728_s15, 4  ;;  %p630_p8 = scmp.ne.s32.totalorder %s865_s0, %s629_s19  ;;  %s22_s16 = int_to_ptr.vmem [resolvable:$true] %s21_s16 }
  0x17   :  { %p633_p9 = scmp.lt.u32.totalorder %s629_s19, %s865_s0 }
  0x19   :  { %p635_p10 = pnand %p633_p9, %p630_p8 }
  0x1b   :  { %638 = shalt.err (!%p635_p10)
}
  0x1c   :  { %s639_s24 = scalar_lea.vmem %s22_s16, 32  ;;  %s643_s1 = scalar_lea.vmem %s22_s16, 128 }
  0x1d   :  { %p640_p11 = scmp.ne.s32.totalorder %s22_s16, %s639_s24  ;;  %p644_p12 = scmp.lt.s32.totalorder %s22_s16, %s22_s16 }
  0x1e   :  { %p645_p13 = scmp.lt.s32.totalorder %s643_s1, %s639_s24 }
  0x20   :  { %p646_p0 = por %p645_p13, %p644_p12 }
  0x22   :  { %p647_p1 = pnand %p646_p0, %p640_p11 }
  0x24   :  { %650 = shalt.err (!%p647_p1)
}
  0x25   :  { %s729_s25 = smov 32   ;;  %s730_s26 = smov 2  }
  0x26   :  { %27 = dma.hbm_to_vmem [thread:$0]  %s865_s0, 32, %s22_s16, [#allocation3], %s729_s25, %s729_s25, %s730_s26  }
  0x27   :  { %s731_s29 = smov [#allocation7]   ;;  %s732_s8 = smov [#allocation8]  }
  0x28   :  { %s47_s30 = sshll.u32 %s731_s29, 4  ;;  %s61_s9 = sshll.u32 %s732_s8, 4  ;;  %s48_s30 = int_to_ptr.vmem [resolvable:$true] %s47_s30  ;;  %s807_s9 = int_to_ptr.vmem [resolvable:$true] %s61_s9 }
  0x29   :  { %s651_s14 = scalar_lea.hbm %s868_s3, 8192 }
  0x2a   :  { %p652_p2 = scmp.ne.s32.totalorder %s868_s3, %s651_s14  ;;  %p655_p3 = scmp.lt.u32.totalorder %s651_s14, %s868_s3 }
  0x2c   :  { %p657_p4 = pnand %p655_p3, %p652_p2 }
  0x2e   :  { %660 = shalt.err (!%p657_p4)
}
  0x2f   :  { %s661_s0 = scalar_lea.vmem %s48_s30, 8192  ;;  %p666_p6 = scmp.lt.s32.totalorder %s48_s30, %s48_s30 }
  0x30   :  { %p662_p5 = scmp.ne.s32.totalorder %s48_s30, %s661_s0  ;;  %p667_p7 = scmp.lt.s32.totalorder %s661_s0, %s661_s0 }
  0x32   :  { %p668_p8 = por %p667_p7, %p666_p6 }
  0x34   :  { %p669_p9 = pnand %p668_p8, %p662_p5 }
  0x36   :  { %672 = shalt.err (!%p669_p9)
}
  0x37   :  { %53 = dma.hbm_to_vmem [thread:$0]  %s868_s3, 8192, %s48_s30, [#allocation6], %s726_s11, %s726_s11, %s727_s12  }
  0x38   :  { %s673_s23 = scalar_lea.hbm %s870_s5, 4096 }
  0x39   :  { %p674_p10 = scmp.ne.s32.totalorder %s870_s5, %s673_s23  ;;  %p677_p11 = scmp.lt.u32.totalorder %s673_s23, %s870_s5 }
  0x3b   :  { %p679_p12 = pnand %p677_p11, %p674_p10 }
  0x3d   :  { %682 = shalt.err (!%p679_p12)
}
  0x3e   :  { %s683_s29 = scalar_lea.vmem %s807_s9, 4096  ;;  %p688_p0 = scmp.lt.s32.totalorder %s807_s9, %s807_s9 }
  0x3f   :  { %p684_p13 = scmp.ne.s32.totalorder %s807_s9, %s683_s29  ;;  %p689_p1 = scmp.lt.s32.totalorder %s683_s29, %s683_s29 }
  0x41   :  { %p690_p2 = por %p689_p1, %p688_p0 }
  0x43   :  { %p691_p3 = pnand %p690_p2, %p684_p13 }
  0x45   :  { %694 = shalt.err (!%p691_p3)
}
  0x46   :  { %s733_s3 = smov 128   ;;  %s734_s11 = smov 8  }
  0x47   :  { %67 = dma.hbm_to_vmem [thread:$0]  %s870_s5, 4096, %s807_s9, [#allocation9], %s733_s3, %s733_s3, %s734_s11  }
  0x48   :  { %717 = dma.done.wait [#allocation3], 128  }
  0x49   :  { %718 = vsyncadd [#allocation3], 4294967168 }
  0x4a   :  { %719 = dma.done.wait [#allocation6], 8704  }
  0x4b   :  { %720 = vsyncadd [#allocation6], 4294958592 }
  0x4c   :  { %721 = dma.done.wait [#allocation9], 4096  }
  0x4d   :  { %722 = vsyncadd [#allocation9], 4294963200  ;;  %v735_v0 = vmov 0.0   ;;  %v84_v1 = vld [vmem:[#allocation5 + $0x8] sm:$0xff]  ;;  %v86_v2 = vld [vmem:[#allocation5 + $0x18] sm:$0xff]  ;;  %vm99_vm0 = vcmask 130048  }
  0x4e   :  { %167 = vmatprep.mubr.f32.mxu0 %v735_v0  ;;  %v83_v3 = vld [vmem:[#allocation5] sm:$0xff]  ;;  %v493_v4 = vpack.c.bf16 %v86_v2, %v84_v1  ;;  %v85_v5 = vld [vmem:[#allocation5 + $0x10] sm:$0xff]  ;;  %v177_v6 = vld [vmem:[#allocation7 + $0x8] sm:$0xff] }
  0x4f   :  { %v495_v7 = vpack.c.bf16 %v85_v5, %v83_v3  ;;  %v82_v8 = vld [vmem:[#allocation2] sm:$0xff]  ;;  %v176_v10 = vld [vmem:[#allocation7] sm:$0xff]  ;;  %v178_v11 = vld [vmem:[#allocation7 + $0x10] sm:$0xff] }
  0x50   :  { %v179_v9 = vld [vmem:[#allocation7 + $0x18] sm:$0xff]  ;;  %494 = vmatprep.subr.bf16.mxu0 %v493_v4  ;;  %v499_v13 = vpack.c.bf16 %v178_v11, %v176_v10  ;;  %v181_v14 = vld [vmem:[#allocation7 + $0x28] sm:$0xff]  ;;  %v180_v16 = vld [vmem:[#allocation7 + $0x20] sm:$0xff] }
  0x51   :  { %v497_v12 = vpack.c.bf16 %v179_v9, %v177_v6  ;;  %v183_v15 = vld [vmem:[#allocation7 + $0x38] sm:$0xff]  ;;  %496 = vmatpush1.bf16.msra.mxu0 %v495_v7  ;;  %v182_v18 = vld [vmem:[#allocation7 + $0x30] sm:$0xff]  ;;  %v185_v19 = vld [vmem:[#allocation7 + $0x48] sm:$0xff] }
  0x52   :  { %v501_v17 = vpack.c.bf16 %v183_v15, %v181_v14  ;;  %v187_v20 = vld [vmem:[#allocation7 + $0x58] sm:$0xff]  ;;  %v503_v21 = vpack.c.bf16 %v182_v18, %v180_v16  ;;  %v184_v23 = vld [vmem:[#allocation7 + $0x40] sm:$0xff]  ;;  %v186_v24 = vld [vmem:[#allocation7 + $0x50] sm:$0xff] }
  0x53   :  { %498 = vmatprep.subr.bf16.mxu1 %v497_v12  ;;  %v505_v22 = vpack.c.bf16 %v187_v20, %v185_v19  ;;  %v189_v25 = vld [vmem:[#allocation7 + $0x68] sm:$0xff]  ;;  %v191_v26 = vld [vmem:[#allocation7 + $0x78] sm:$0xff]  ;;  %v507_v27 = vpack.c.bf16 %v186_v24, %v184_v23  ;;  %v188_v29 = vld [vmem:[#allocation7 + $0x60] sm:$0xff] }
  0x54   :  { %500 = vmatpush1.bf16.msra.mxu1 %v499_v13  ;;  %456 = vmatmul.mubr.msk.f32.vlgmr.msra.gmra.mrb[0].mxu0 %vm99_vm0, %v82_v8  ;;  %v509_v28 = vpack.c.bf16 %v191_v26, %v189_v25  ;;  %v190_v30 = vld [vmem:[#allocation7 + $0x70] sm:$0xff]  ;;  %v193_v31 = vld [vmem:[#allocation7 + $0x88] sm:$0xff]  ;;  %v195_v32 = vld [vmem:[#allocation7 + $0x98] sm:$0xff] }
  0x55   :  { %502 = vmatprep.subr.bf16.mxu1 %v501_v17  ;;  %v511_v33 = vpack.c.bf16 %v190_v30, %v188_v29  ;;  %v513_v34 = vpack.c.bf16 %v195_v32, %v193_v31  ;;  %v192_v35 = vld [vmem:[#allocation7 + $0x80] sm:$0xff]  ;;  %v194_v36 = vld [vmem:[#allocation7 + $0x90] sm:$0xff]  ;;  %v197_v37 = vld [vmem:[#allocation7 + $0xa8] sm:$0xff] }
  0x56   :  { %v199_v38 = vld [vmem:[#allocation7 + $0xb8] sm:$0xff]  ;;  %v515_v39 = vpack.c.bf16 %v194_v36, %v192_v35  ;;  %v196_v41 = vld [vmem:[#allocation7 + $0xa0] sm:$0xff]  ;;  %v198_v42 = vld [vmem:[#allocation7 + $0xb0] sm:$0xff] }
  0x57   :  { %v517_v40 = vpack.c.bf16 %v199_v38, %v197_v37  ;;  %v201_v43 = vld [vmem:[#allocation7 + $0xc8] sm:$0xff]  ;;  %v203_v44 = vld [vmem:[#allocation7 + $0xd8] sm:$0xff]  ;;  %v519_v45 = vpack.c.bf16 %v198_v42, %v196_v41  ;;  %v200_v47 = vld [vmem:[#allocation7 + $0xc0] sm:$0xff] }
  0x58   :  { %504 = vmatpush1.bf16.msra.mxu1 %v503_v21  ;;  %v521_v46 = vpack.c.bf16 %v203_v44, %v201_v43  ;;  %v202_v48 = vld [vmem:[#allocation7 + $0xd0] sm:$0xff]  ;;  %v205_v49 = vld [vmem:[#allocation7 + $0xe8] sm:$0xff]  ;;  %v207_v50 = vld [vmem:[#allocation7 + $0xf8] sm:$0xff] }
  0x59   :  { %506 = vmatprep.subr.bf16.mxu1 %v505_v22  ;;  %v523_v51 = vpack.c.bf16 %v202_v48, %v200_v47  ;;  %v525_v52 = vpack.c.bf16 %v207_v50, %v205_v49  ;;  %v204_v53 = vld [vmem:[#allocation7 + $0xe0] sm:$0xff]  ;;  %v206_v54 = vld [vmem:[#allocation7 + $0xf0] sm:$0xff]  ;;  %v209_v55 = vld [vmem:[#allocation7 + $0x108] sm:$0xff] }
  0x5a   :  { %v211_v56 = vld [vmem:[#allocation7 + $0x118] sm:$0xff]  ;;  %v527_v57 = vpack.c.bf16 %v206_v54, %v204_v53  ;;  %v208_v59 = vld [vmem:[#allocation7 + $0x100] sm:$0xff]  ;;  %v210_v60 = vld [vmem:[#allocation7 + $0x110] sm:$0xff] }
  0x5b   :  { %v529_v58 = vpack.c.bf16 %v211_v56, %v209_v55  ;;  %v213_v61 = vld [vmem:[#allocation7 + $0x128] sm:$0xff]  ;;  %v215_v62 = vld [vmem:[#allocation7 + $0x138] sm:$0xff]  ;;  %v531_v63 = vpack.c.bf16 %v210_v60, %v208_v59  ;;  %v212_v1 = vld [vmem:[#allocation7 + $0x120] sm:$0xff] }
  0x5c   :  { %508 = vmatpush1.bf16.msra.mxu1 %v507_v27  ;;  %v533_v0 = vpack.c.bf16 %v215_v62, %v213_v61  ;;  %v214_v2 = vld [vmem:[#allocation7 + $0x130] sm:$0xff]  ;;  %v217_v3 = vld [vmem:[#allocation7 + $0x148] sm:$0xff]  ;;  %v219_v4 = vld [vmem:[#allocation7 + $0x158] sm:$0xff] }
  0x5d   :  { %510 = vmatprep.subr.bf16.mxu1 %v509_v28  ;;  %v535_v5 = vpack.c.bf16 %v214_v2, %v212_v1  ;;  %v537_v6 = vpack.c.bf16 %v219_v4, %v217_v3  ;;  %v216_v7 = vld [vmem:[#allocation7 + $0x140] sm:$0xff]  ;;  %v218_v8 = vld [vmem:[#allocation7 + $0x150] sm:$0xff]  ;;  %v221_v9 = vld [vmem:[#allocation7 + $0x168] sm:$0xff] }
  0x5e   :  { %v223_v10 = vld [vmem:[#allocation7 + $0x178] sm:$0xff]  ;;  %v539_v11 = vpack.c.bf16 %v218_v8, %v216_v7  ;;  %v220_v13 = vld [vmem:[#allocation7 + $0x160] sm:$0xff]  ;;  %v222_v14 = vld [vmem:[#allocation7 + $0x170] sm:$0xff] }
  0x5f   :  { %v541_v12 = vpack.c.bf16 %v223_v10, %v221_v9  ;;  %v225_v15 = vld [vmem:[#allocation7 + $0x188] sm:$0xff]  ;;  %v227_v16 = vld [vmem:[#allocation7 + $0x198] sm:$0xff]  ;;  %v543_v17 = vpack.c.bf16 %v222_v14, %v220_v13  ;;  %v224_v19 = vld [vmem:[#allocation7 + $0x180] sm:$0xff] }
  0x60   :  { %512 = vmatpush1.bf16.msra.mxu1 %v511_v33  ;;  %v545_v18 = vpack.c.bf16 %v227_v16, %v225_v15  ;;  %v226_v20 = vld [vmem:[#allocation7 + $0x190] sm:$0xff]  ;;  %v229_v21 = vld [vmem:[#allocation7 + $0x1a8] sm:$0xff]  ;;  %v231_v22 = vld [vmem:[#allocation7 + $0x1b8] sm:$0xff]  ;;  %v89_v15 = vlaneseq }
  0x61   :  { %514 = vmatprep.subr.bf16.mxu1 %v513_v34  ;;  %v547_v23 = vpack.c.bf16 %v226_v20, %v224_v19  ;;  %v549_v24 = vpack.c.bf16 %v231_v22, %v229_v21  ;;  %v228_v25 = vld [vmem:[#allocation7 + $0x1a0] sm:$0xff]  ;;  %v230_v26 = vld [vmem:[#allocation7 + $0x1b0] sm:$0xff]  ;;  %v233_v27 = vld [vmem:[#allocation7 + $0x1c8] sm:$0xff] }
  0x62   :  { %v235_v28 = vld [vmem:[#allocation7 + $0x1d8] sm:$0xff]  ;;  %v551_v29 = vpack.c.bf16 %v230_v26, %v228_v25  ;;  %v232_v31 = vld [vmem:[#allocation7 + $0x1c0] sm:$0xff]  ;;  %v234_v32 = vld [vmem:[#allocation7 + $0x1d0] sm:$0xff]  ;;  %v90_v16 = vshrl.u32 %v89_v15, 7 }
  0x63   :  { %v553_v30 = vpack.c.bf16 %v235_v28, %v233_v27  ;;  %v555_v33 = vpack.c.bf16 %v234_v32, %v232_v31  ;;  %v237_v34 = vld [vmem:[#allocation7 + $0x1e8] sm:$0xff]  ;;  %v239_v35 = vld [vmem:[#allocation7 + $0x1f8] sm:$0xff]  ;;  %v236_v37 = vld [vmem:[#allocation7 + $0x1e0] sm:$0xff] }
  0x64   :  { %516 = vmatpush1.bf16.msra.mxu1 %v515_v39  ;;  %v557_v36 = vpack.c.bf16 %v239_v35, %v237_v34  ;;  %v238_v38 = vld [vmem:[#allocation7 + $0x1f0] sm:$0xff]  ;;  %v342_v41 = vld [vmem:[#allocation8 + $0x88] sm:$0xff]  ;;  %v325_v42 = vld [vmem:[#allocation8] sm:$0xff]  ;;  %v95_v19 = vsub.s32 1, %v90_v16 }
  0x65   :  { %518 = vmatprep.subr.bf16.mxu1 %v517_v40  ;;  %v559_v39 = vpack.c.bf16 %v238_v38, %v236_v37  ;;  %v341_v40 = vld [vmem:[#allocation8 + $0x80] sm:$0xff]  ;;  %v326_v44 = vld [vmem:[#allocation8 + $0x8] sm:$0xff]  ;;  %v327_v49 = vld [vmem:[#allocation8 + $0x10] sm:$0xff] }
  0x66   :  { %v561_v43 = vpack.c.bf16 %v342_v41, %v341_v40  ;;  %v563_v47 = vpack.c.bf16 %v326_v44, %v325_v42  ;;  %v328_v50 = vld [vmem:[#allocation8 + $0x18] sm:$0xff]  ;;  %v329_v55 = vld [vmem:[#allocation8 + $0x20] sm:$0xff]  ;;  %v330_v56 = vld [vmem:[#allocation8 + $0x28] sm:$0xff] }
  0x67   :  { %v567_v53 = vpack.c.bf16 %v328_v50, %v327_v49  ;;  %v571_v59 = vpack.c.bf16 %v330_v56, %v329_v55  ;;  %v331_v61 = vld [vmem:[#allocation8 + $0x30] sm:$0xff]  ;;  %v332_v62 = vld [vmem:[#allocation8 + $0x38] sm:$0xff]  ;;  %v333_v3 = vld [vmem:[#allocation8 + $0x40] sm:$0xff] }
  0x68   :  { %520 = vmatpush1.bf16.msra.mxu1 %v519_v45  ;;  %v343_v45 = vld [vmem:[#allocation8 + $0x90] sm:$0xff]  ;;  %562 = vmatprep.subr.bf16.mxu0 %v561_v43  ;;  %v575_v1 = vpack.c.bf16 %v332_v62, %v331_v61  ;;  %v334_v4 = vld [vmem:[#allocation8 + $0x48] sm:$0xff]  ;;  %v336_v10 = vld [vmem:[#allocation8 + $0x58] sm:$0xff] }
  0x69   :  { %522 = vmatprep.subr.bf16.mxu1 %v521_v46  ;;  %v344_v46 = vld [vmem:[#allocation8 + $0x98] sm:$0xff]  ;;  %564 = vmatpush3.bf16.msra.mxu0 %v563_v47  ;;  %v579_v7 = vpack.c.bf16 %v334_v4, %v333_v3  ;;  %v335_v9 = vld [vmem:[#allocation8 + $0x50] sm:$0xff]  ;;  %v337_v28 = vld [vmem:[#allocation8 + $0x60] sm:$0xff] }
  0x6a   :  { %v565_v48 = vpack.c.bf16 %v344_v46, %v343_v45  ;;  %v583_v13 = vpack.c.bf16 %v336_v10, %v335_v9  ;;  %v355_v31 = vld [vmem:[#allocation8 + $0xf0] sm:$0xff]  ;;  %v356_v32 = vld [vmem:[#allocation8 + $0xf8] sm:$0xff] }
  0x6b   :  { %v339_v34 = vld [vmem:[#allocation8 + $0x70] sm:$0xff]  ;;  %v340_v35 = vld [vmem:[#allocation8 + $0x78] sm:$0xff] }
  0x6c   :  { %524 = vmatpush1.bf16.msra.mxu1 %v523_v51  ;;  %v345_v51 = vld [vmem:[#allocation8 + $0xa0] sm:$0xff]  ;;  %566 = vmatprep.subr.bf16.mxu0 %v565_v48  ;;  %v240_v37 = vld [vmem:[%s869_s4] sm:$0x3] }
  0x6d   :  { %526 = vmatprep.subr.bf16.mxu1 %v525_v52  ;;  %v346_v52 = vld [vmem:[#allocation8 + $0xa8] sm:$0xff]  ;;  %568 = vmatpush3.bf16.msra.mxu0 %v567_v53  ;;  %v457_v47 = vld [vmem:[%s871_s6] ss:$0 sm:$0xff] }
  0x6e   :  { %v569_v54 = vpack.c.bf16 %v346_v52, %v345_v51 }
  0x70   :  { %528 = vmatpush1.bf16.msra.mxu1 %v527_v57  ;;  %v347_v57 = vld [vmem:[#allocation8 + $0xb0] sm:$0xff]  ;;  %570 = vmatprep.subr.bf16.mxu0 %v569_v54 }
  0x71   :  { %530 = vmatprep.subr.bf16.mxu1 %v529_v58  ;;  %v348_v58 = vld [vmem:[#allocation8 + $0xb8] sm:$0xff]  ;;  %572 = vmatpush3.bf16.msra.mxu0 %v571_v59 }
  0x72   :  { %v573_v60 = vpack.c.bf16 %v348_v58, %v347_v57 }
  0x74   :  { %532 = vmatpush1.bf16.msra.mxu1 %v531_v63  ;;  %v349_v63 = vld [vmem:[#allocation8 + $0xc0] sm:$0xff]  ;;  %574 = vmatprep.subr.bf16.mxu0 %v573_v60 }
  0x75   :  { %534 = vmatprep.subr.bf16.mxu1 %v533_v0  ;;  %v350_v0 = vld [vmem:[#allocation8 + $0xc8] sm:$0xff]  ;;  %576 = vmatpush3.bf16.msra.mxu0 %v575_v1 }
  0x76   :  { %v577_v2 = vpack.c.bf16 %v350_v0, %v349_v63 }
  0x78   :  { %536 = vmatpush1.bf16.msra.mxu1 %v535_v5  ;;  %v351_v5 = vld [vmem:[#allocation8 + $0xd0] sm:$0xff]  ;;  %578 = vmatprep.subr.bf16.mxu0 %v577_v2 }
  0x79   :  { %538 = vmatprep.subr.bf16.mxu1 %v537_v6  ;;  %v352_v6 = vld [vmem:[#allocation8 + $0xd8] sm:$0xff]  ;;  %580 = vmatpush3.bf16.msra.mxu0 %v579_v7 }
  0x7a   :  { %v581_v8 = vpack.c.bf16 %v352_v6, %v351_v5 }
  0x7c   :  { %540 = vmatpush1.bf16.msra.mxu1 %v539_v11  ;;  %v353_v11 = vld [vmem:[#allocation8 + $0xe0] sm:$0xff]  ;;  %582 = vmatprep.subr.bf16.mxu0 %v581_v8 }
  0x7d   :  { %542 = vmatprep.subr.bf16.mxu1 %v541_v12  ;;  %v354_v12 = vld [vmem:[#allocation8 + $0xe8] sm:$0xff]  ;;  %584 = vmatpush3.bf16.msra.mxu0 %v583_v13 }
  0x7e   :  { %v585_v14 = vpack.c.bf16 %v354_v12, %v353_v11 }
  0x80   :  { %544 = vmatpush1.bf16.msra.mxu1 %v543_v17  ;;  %586 = vmatprep.subr.bf16.mxu0 %v585_v14  ;;  %v91_v17 = vsub.s32 0, %v90_v16 }
  0x81   :  { %546 = vmatprep.subr.bf16.mxu1 %v545_v18  ;;  %v87_v18 = vld [vmem:[%s867_s2] sm:$0x3] }
  0x82   :  { %v92_v20 = vrot.slane %v87_v18, %v91_v17  ;;  %v96_v21 = vrot.slane %v87_v18, %v95_v19  ;;  %v245_v38 = vrot.slane %v240_v37, %v91_v17 }
  0x84   :  { %548 = vmatpush1.bf16.msra.mxu1 %v547_v23 }
  0x85   :  { %550 = vmatprep.subr.bf16.mxu1 %v549_v24 }
  0x88   :  { %552 = vmatpush1.bf16.msra.mxu1 %v551_v29  ;;  %v338_v29 = vld [vmem:[#allocation8 + $0x68] sm:$0xff] }
  0x89   :  { %554 = vmatprep.subr.bf16.mxu1 %v553_v30  ;;  %v587_v30 = vpack.c.bf16 %v338_v29, %v337_v28 }
  0x8b   :  { %588 = vmatpush3.bf16.msra.mxu0 %v587_v30 }
  0x8c   :  { %556 = vmatpush1.bf16.msra.mxu1 %v555_v33  ;;  %v589_v33 = vpack.c.bf16 %v356_v32, %v355_v31 }
  0x8d   :  { %558 = vmatprep.subr.bf16.mxu1 %v557_v36  ;;  %v591_v36 = vpack.c.bf16 %v340_v35, %v339_v34 }
  0x8e   :  { %590 = vmatprep.subr.bf16.mxu0 %v589_v33 }
  0x8f   :  { %592 = vmatpush3.bf16.msra.mxu0 %v591_v36 }
  0x90   :  { %560 = vmatpush1.bf16.msra.mxu1 %v559_v39  ;;  %v249_v39 = vrot.slane %v240_v37, %v95_v19 }
 0x127   :  { %v169_v22 = vpop.f32.mrb[0].mxu0 }
 0x128   :  { %v170_v23 = vadd.f32 %v169_v22, %v92_v20  ;;  %v171_v24 = vpop.f32.mrb[1].mxu0 }
 0x129   :  { %v172_v25 = vadd.f32 %v171_v24, %v96_v21 }
 0x12a   :  { %v174_v27 = vmax.f32 %v170_v23, 0.0 }
 0x12b   :  { %v175_v26 = vmax.f32 %v172_v25, 0.0 }
 0x12d   :  { %316 = vmatprep.mubr.f32.mxu1 %v175_v26 }
 0x12e   :  { %317 = vmatmul.mubr.f32.vlgmr.msra.gmra.mrb[0].mxu1 %v174_v27 }
 0x201   :  { %v318_v40 = vpop.f32.mrb[0].mxu1 }
 0x202   :  { %v319_v41 = vadd.f32 %v318_v40, %v245_v38  ;;  %v320_v42 = vpop.f32.mrb[1].mxu1 }
 0x203   :  { %v321_v43 = vadd.f32 %v320_v42, %v249_v39 }
 0x204   :  { %v323_v45 = vmax.f32 %v319_v41, 0.0 }
 0x205   :  { %v324_v44 = vmax.f32 %v321_v43, 0.0 }
 0x207   :  { %428 = vmatprep.mubr.f32.mxu0 %v324_v44 }
 0x208   :  { %429 = vmatmul.mubr.f32.vlgmr.msra.gmra.mrb[2].mxu0 %v323_v45 }
 0x2db   :  { %v490_v46 = vpop.f32.mrb[2].mxu0 }
 0x2dc   :  { %v491_v48 = vpop.f32.mrb[3].mxu0 }
 0x2dd   :  { %v492_v49 = vadd.f32 %v491_v48, %v490_v46 }
 0x2df   :  { %v431_v50 = vadd.f32 %v492_v49, %v457_v47 }
 0x2e1   :  { %605 = vtanh.f32 %v431_v50 }
 0x2eb   :  { %v606_v51 = vpop.eup %605 }
 0x2ec   :  { %v435_v52 = vmul.f32 2.5, %v606_v51 }
 0x2ee   :  { %436 = vst [vmem:[#allocation10] sm:$0xff] %v435_v52 }
 0x2ef   :  { %441 = vsyncadd [#allocation4], 96  ;;  %s736_s4 = smov [#allocation10]  }
 0x2f0   :  { %s442_s14 = sshll.u32 %s736_s4, 4  ;;  %s443_s14 = int_to_ptr.vmem [resolvable:$true] %s442_s14 }
 0x2f1   :  { %s695_s15 = scalar_lea.vmem %s443_s14, 32  ;;  %s699_s17 = scalar_lea.vmem %s443_s14, 128 }
 0x2f2   :  { %p696_p4 = scmp.ne.s32.totalorder %s443_s14, %s695_s15  ;;  %p700_p5 = scmp.lt.s32.totalorder %s443_s14, %s443_s14 }
 0x2f3   :  { %p701_p6 = scmp.lt.s32.totalorder %s699_s17, %s695_s15 }
 0x2f5   :  { %p702_p7 = por %p701_p6, %p700_p5 }
 0x2f7   :  { %p703_p8 = pnand %p702_p7, %p696_p4 }
 0x2f9   :  { %706 = shalt.err (!%p703_p8)
}
 0x2fa   :  { %s707_s19 = scalar_lea.hbm %s872_s7, 32 }
 0x2fb   :  { %p708_p9 = scmp.ne.s32.totalorder %s872_s7, %s707_s19  ;;  %p711_p10 = scmp.lt.u32.totalorder %s707_s19, %s872_s7 }
 0x2fd   :  { %p713_p11 = pnand %p711_p10, %p708_p9 }
 0x2ff   :  { %716 = shalt.err (!%p713_p11)
}
 0x300   :  { %448 = dma.vmem_to_hbm [thread:$0]  %s443_s14, 32, %s872_s7, [#allocation4], %s729_s25, %s729_s25, %s730_s26  }
 0x301   :  { %723 = dma.done.wait [#allocation4], 128  }
 0x302   :  { %724 = vsyncadd [#allocation4], 4294967168 }
 0x303   :  { %452 = vsyncpa [#allocation3], 1 }
 0x304   :  { %453 = vsyncpa [#allocation6], 1 }
 0x305   :  { %454 = vsyncpa [#allocation9], 1 }
 0x306   :  { %455 = vsyncpa [#allocation4], 1 }

</bundles_post_ra>
